<compile_context>
chip_gen: v7x
topology: tpu7x:2x2x1
jax: 0.10.0
libtpu: 0.0.40
codegen_flags: <defaults>
</compile_context>

<pallas_src>
import functools

import jax
import jax.numpy as jnp
from jax.experimental import pallas as pl
from jax.experimental.pallas import tpu as pltpu


def _conv_relu_kernel(x_ref, w_ref, b_ref, o_ref, *, KH, KW, th, Wo, Wp,
                      multi_row_tile):
    """Grid step = (batch element, output-row tile).

    x_ref: (1, Cin, Lpad)     zero-padded image, rows flattened into lanes
                              (resident across row tiles of one batch element)
    w_ref: (Cout, KH*KW*Cin)  weights, K ordered as (kh, kw, ci)
    b_ref: (Cout, 1)          bias (f32), channels on sublanes
    o_ref: (1, Cout, th*Wo)   flattened, lane-dense output tile
    """
    Cout = w_ref.shape[0]

    if multi_row_tile:
        # Dynamic lane-start slices for the rare multi-row-tile case.
        # TODO(synk): if a Mosaic version rejects minormost-dim dynamic
        # slicing, fall back to a sublane-banded (4-D) input for this path.
        base = pl.program_id(1) * (th * Wp)
    else:
        base = 0  # single row tile per image: all tap offsets are static

    # im2col over full Wp-wide rows: each tap is ONE contiguous lane slice of
    # the flattened image -- no per-tap sublane->lane relayout.
    taps = []
    for kh in range(KH):
        for kw in range(KW):
            taps.append(x_ref[0, :, pl.ds(base + kh * Wp + kw, th * Wp)])
    patches = jnp.concatenate(taps, axis=0)                 # (KH*KW*Cin, th*Wp)

    # Single MXU push, f32 accumulation (operands share dtype by construction).
    acc = jnp.dot(w_ref[...], patches,
                  preferred_element_type=jnp.float32)       # (Cout, th*Wp)

    # Single valid-column compaction: drop the KW-1 wrap-around columns per
    # output row, then fold back to a lane-dense (Cout, th*Wo) tile.
    acc = acc.reshape(Cout, th, Wp)[:, :, :Wo].reshape(Cout, th * Wo)

    acc = jnp.maximum(acc + b_ref[...], 0.0)                # bias + ReLU (f32)
    o_ref[0] = acc.astype(o_ref.dtype)


def _pick_row_tile(Ho, Wo, max_lanes=2048):
    """Pick th | Ho. Prefer the largest divisor whose output tile (th*Wo) is
    lane-dense (multiple of 128) and fits max_lanes; otherwise the largest
    fitting divisor. Sub-128 tiles only remain for genuinely tiny maps."""
    divisors = [d for d in range(1, Ho + 1) if Ho % d == 0]
    fitting = [d for d in divisors if d * Wo <= max_lanes]
    if not fitting:
        # TODO(synk): very wide rows (Wo > max_lanes) would also need column
        # tiling; fall back to one row per step.
        return 1
    dense = [d for d in fitting if (d * Wo) % 128 == 0]
    return max(dense) if dense else max(fitting)


def conv2d_relu(x, weight, bias, *, padding="same", stride=1, compute_dtype=None):
    """Conv2d + ReLU for one (stacked) feature map. NCHW in, NCHW out."""
    if stride != 1:
        # TODO(synk): strided conv (stride > 1) not implemented in the kernel.
        raise NotImplementedError("stride > 1 not supported")

    N, Cin, H, W = x.shape
    Cout, _, KH, KW = weight.shape

    if padding == "same":
        # PyTorch "same" (stride 1): extra pad on bottom/right for even kernels.
        ph_lo, pw_lo = (KH - 1) // 2, (KW - 1) // 2
        ph_hi, pw_hi = KH - 1 - ph_lo, KW - 1 - pw_lo
        xp = jnp.pad(x, ((0, 0), (0, 0), (ph_lo, ph_hi), (pw_lo, pw_hi)))
        Ho, Wo = H, W
    elif padding == "valid":
        xp = x
        Ho, Wo = H - KH + 1, W - KW + 1
        if Ho <= 0 or Wo <= 0:
            raise ValueError("kernel larger than input with 'valid' padding")
    else:
        raise ValueError(padding)

    Hp, Wp = xp.shape[2], xp.shape[3]
    K = KH * KW * Cin

    # Flatten padded rows into the lane axis (contiguous reshape, no transpose)
    # and add a small zero tail so the last row tile's taps stay in bounds;
    # round the flat length up to a lane multiple.
    Lmin = Hp * Wp + (KW - 1)
    Lpad = ((Lmin + 127) // 128) * 128
    x_flat = xp.reshape(N, Cin, Hp * Wp)
    x_flat = jnp.pad(x_flat, ((0, 0), (0, 0), (0, Lpad - Hp * Wp)))

    # Cast ONCE in HBM (not per grid step in-kernel); f32 by default.
    if compute_dtype is not None:
        x_flat = x_flat.astype(compute_dtype)
    # Weights as one (Cout, KH*KW*Cin) matrix, K ordered (kh, kw, ci) to match
    # the kernel's tap order.  Tiny; done once per (jitted) call.
    w2 = jnp.transpose(weight, (0, 2, 3, 1)).reshape(Cout, K).astype(x_flat.dtype)
    b2 = bias.reshape(Cout, 1).astype(jnp.float32)

    th = _pick_row_tile(Ho, Wo)
    n_row_tiles = Ho // th
    grid = (N, n_row_tiles)

    # VMEM budget: the flattened image is resident across row tiles (only
    # re-fetched per batch element), so count it once; the output tile is
    # double-buffered.  Only raise the scoped limit when the image gets big,
    # and stay well below v7x's 64 MiB physical VMEM.
    in_item = jnp.dtype(x_flat.dtype).itemsize
    out_item = jnp.dtype(x.dtype).itemsize
    est = (Cin * Lpad * in_item
           + 2 * Cout * th * Wo * out_item
           + Cout * (K + 1) * 4)
    cparams = dict(dimension_semantics=("parallel", "arbitrary"))
    if est > 12 * 1024 * 1024:
        # TODO(synk): for images too large to keep resident, switch to a
        # halo-row-tiled input path (manual DMA) instead of raising the limit.
        cparams["vmem_limit_bytes"] = min(int(1.5 * est), 48 * 1024 * 1024)

    kernel = functools.partial(_conv_relu_kernel, KH=KH, KW=KW, th=th, Wo=Wo,
                               Wp=Wp, multi_row_tile=(n_row_tiles > 1))
    out_flat = pl.pallas_call(
        kernel,
        out_shape=jax.ShapeDtypeStruct((N, Cout, Ho * Wo), x.dtype),
        grid=grid,
        in_specs=[
            # Whole flattened padded image; index_map ignores the row-tile axis
            # so it is fetched once per batch element and stays resident.
            pl.BlockSpec((1, Cin, Lpad), lambda n, i: (n, 0, 0)),
            pl.BlockSpec((Cout, K), lambda n, i: (0, 0)),
            pl.BlockSpec((Cout, 1), lambda n, i: (0, 0)),
        ],
        out_specs=pl.BlockSpec((1, Cout, th * Wo), lambda n, i: (n, 0, i)),
        compiler_params=pltpu.CompilerParams(**cparams),
    )(x_flat, w2, b2)

    # Contiguous reshape back to NCHW: no transpose, no extra HBM pass.
    return out_flat.reshape(N, Cout, Ho, Wo)


def _conv_group(feats, weight, bias, *, padding, stride, compute_dtype):
    """Run one pallas_call for a group of same-shaped feature maps."""
    if len(feats) == 1:
        return [conv2d_relu(feats[0], weight, bias, padding=padding,
                            stride=stride, compute_dtype=compute_dtype)]
    x = jnp.concatenate(feats, axis=0)
    y = conv2d_relu(x, weight, bias, padding=padding, stride=stride,
                    compute_dtype=compute_dtype)
    outs, off = [], 0
    for f in feats:
        n = f.shape[0]
        outs.append(y[off:off + n])
        off += n
    return outs


class ConvPallas:
    """Pallas equivalent of rslearn Conv: Conv2d + ReLU applied per feature map."""

    def __init__(self, in_channels, out_channels, kernel_size,
                 padding="same", stride=1, compute_dtype=None, key=None):
        self.padding = padding
        self.stride = stride
        key = key if key is not None else jax.random.PRNGKey(0)
        kw_key, kb_key = jax.random.split(key)
        fan_in = in_channels * kernel_size * kernel_size
        bound = 1.0 / (fan_in ** 0.5)
        # Deterministic init mirroring PyTorch Conv2d uniform(-1/sqrt(fan_in), ...)
        self.weight = jax.random.uniform(
            kw_key, (out_channels, in_channels, kernel_size, kernel_size),
            minval=-bound, maxval=bound, dtype=jnp.float32)
        self.bias = jax.random.uniform(
            kb_key, (out_channels,), minval=-bound, maxval=bound,
            dtype=jnp.float32)
        # One jitted dispatch per group of same-shaped maps; XLA caches one
        # compilation per distinct (count, shape) signature.
        self._conv_group = jax.jit(functools.partial(
            _conv_group, padding=padding, stride=stride,
            compute_dtype=compute_dtype))

    def __call__(self, features, inputs=None):
        # `inputs` is ignored, matching the PyTorch module.
        # Group same-shaped maps into a single pallas_call (fewer dispatches).
        groups = {}
        for idx, f in enumerate(features):
            groups.setdefault(tuple(f.shape), []).append(idx)
        out = [None] * len(features)
        for idxs in groups.values():
            ys = self._conv_group([features[i] for i in idxs],
                                  self.weight, self.bias)
            for i, y in zip(idxs, ys):
                out[i] = y
        return out


def _reference(features, weight, bias, padding):
    """Pure-JAX reference (lax conv) for correctness check."""
    outs = []
    for f in features:
        o = jax.lax.conv_general_dilated(
            f, weight, window_strides=(1, 1),
            padding="SAME" if padding == "same" else "VALID",
            dimension_numbers=("NCHW", "OIHW", "NCHW"))
        o = o + bias[None, :, None, None]
        outs.append(jnp.maximum(o, 0.0))
    return outs


if __name__ == "__main__":
    key = jax.random.PRNGKey(0)
    k1, k2, k3, k4, k5 = jax.random.split(key, 5)

    in_channels, out_channels, kernel_size = 4, 8, 3
    conv = ConvPallas(in_channels, out_channels, kernel_size,
                      padding="same", stride=1, key=k5)

    # Multi-scale feature maps (list), NCHW as in PyTorch.  Two 16x16 maps
    # exercise the same-shape grouping (one fused pallas_call, N=4); 32x32
    # gives a 1024-lane dense output block; 8x8 hits the tiny-map fallback.
    features = [
        jax.random.normal(k1, (2, in_channels, 16, 16), dtype=jnp.float32),
        jax.random.normal(k2, (2, in_channels, 8, 8), dtype=jnp.float32),
        jax.random.normal(k3, (2, in_channels, 32, 32), dtype=jnp.float32),
        jax.random.normal(k4, (2, in_channels, 16, 16), dtype=jnp.float32),
    ]

    outs = conv(features, inputs=None)
    outs = [jax.block_until_ready(o) for o in outs]

    refs = _reference(features, conv.weight, conv.bias, "same")
    for o, r in zip(outs, refs):
        assert o.shape == r.shape, (o.shape, r.shape)
        assert jnp.allclose(o, r, atol=1e-5, rtol=1e-5), "mismatch vs reference"

    print("KERNEL_OK")
</pallas_src>

<mosaic_0001>
module attributes {stable_mosaic.version = 11 : i64} {
  func.func @_conv_relu_kernel(%arg0: i32, %arg1: i32, %arg2: memref<1x4x384xf32, #tpu.memory_space<vmem>>, %arg3: memref<8x36xf32, #tpu.memory_space<vmem>>, %arg4: memref<8x1xf32, #tpu.memory_space<vmem>>, %arg5: memref<1x8x256xf32, #tpu.memory_space<vmem>>) attributes {dimension_semantics = [#tpu.dimension_semantics<parallel>, #tpu.dimension_semantics<arbitrary>], iteration_bounds = array<i64: 4, 1>, scalar_prefetch = 0 : i64, scratch_operands = 0 : i64, tpu.core_type = #tpu.core_type<tc>, window_params = [{transform_indices = @transform_0, window_bounds = array<i64: 1, 4, 384>}, {pipeline_mode = #tpu.pipeline_mode<synchronous>, transform_indices = @transform_1, window_bounds = array<i64: 8, 36>}, {pipeline_mode = #tpu.pipeline_mode<synchronous>, transform_indices = @transform_2, window_bounds = array<i64: 8, 1>}, {transform_indices = @transform_3, window_bounds = array<i64: 1, 8, 256>}]} {
    %c0 = arith.constant 0 : index
    %c0_0 = arith.constant 0 : index
    %c0_1 = arith.constant 0 : index
    %0 = vector.load %arg2[%c0, %c0_0, %c0_1] : memref<1x4x384xf32, #tpu.memory_space<vmem>>, vector<1x4x288xf32>
    %1 = vector.shape_cast %0 : vector<1x4x288xf32> to vector<4x288xf32>
    %c0_2 = arith.constant 0 : index
    %c0_3 = arith.constant 0 : index
    %c1 = arith.constant 1 : index
    %2 = vector.load %arg2[%c0_2, %c0_3, %c1] : memref<1x4x384xf32, #tpu.memory_space<vmem>>, vector<1x4x288xf32>
    %3 = vector.shape_cast %2 : vector<1x4x288xf32> to vector<4x288xf32>
    %c0_4 = arith.constant 0 : index
    %c0_5 = arith.constant 0 : index
    %c2 = arith.constant 2 : index
    %4 = vector.load %arg2[%c0_4, %c0_5, %c2] : memref<1x4x384xf32, #tpu.memory_space<vmem>>, vector<1x4x288xf32>
    %5 = vector.shape_cast %4 : vector<1x4x288xf32> to vector<4x288xf32>
    %c0_6 = arith.constant 0 : index
    %c0_7 = arith.constant 0 : index
    %c18 = arith.constant 18 : index
    %6 = vector.load %arg2[%c0_6, %c0_7, %c18] : memref<1x4x384xf32, #tpu.memory_space<vmem>>, vector<1x4x288xf32>
    %7 = vector.shape_cast %6 : vector<1x4x288xf32> to vector<4x288xf32>
    %c0_8 = arith.constant 0 : index
    %c0_9 = arith.constant 0 : index
    %c19 = arith.constant 19 : index
    %8 = vector.load %arg2[%c0_8, %c0_9, %c19] : memref<1x4x384xf32, #tpu.memory_space<vmem>>, vector<1x4x288xf32>
    %9 = vector.shape_cast %8 : vector<1x4x288xf32> to vector<4x288xf32>
    %c0_10 = arith.constant 0 : index
    %c0_11 = arith.constant 0 : index
    %c20 = arith.constant 20 : index
    %10 = vector.load %arg2[%c0_10, %c0_11, %c20] : memref<1x4x384xf32, #tpu.memory_space<vmem>>, vector<1x4x288xf32>
    %11 = vector.shape_cast %10 : vector<1x4x288xf32> to vector<4x288xf32>
    %c0_12 = arith.constant 0 : index
    %c0_13 = arith.constant 0 : index
    %c36 = arith.constant 36 : index
    %12 = vector.load %arg2[%c0_12, %c0_13, %c36] : memref<1x4x384xf32, #tpu.memory_space<vmem>>, vector<1x4x288xf32>
    %13 = vector.shape_cast %12 : vector<1x4x288xf32> to vector<4x288xf32>
    %c0_14 = arith.constant 0 : index
    %c0_15 = arith.constant 0 : index
    %c37 = arith.constant 37 : index
    %14 = vector.load %arg2[%c0_14, %c0_15, %c37] : memref<1x4x384xf32, #tpu.memory_space<vmem>>, vector<1x4x288xf32>
    %15 = vector.shape_cast %14 : vector<1x4x288xf32> to vector<4x288xf32>
    %c0_16 = arith.constant 0 : index
    %c0_17 = arith.constant 0 : index
    %c38 = arith.constant 38 : index
    %16 = vector.load %arg2[%c0_16, %c0_17, %c38] : memref<1x4x384xf32, #tpu.memory_space<vmem>>, vector<1x4x288xf32>
    %17 = vector.shape_cast %16 : vector<1x4x288xf32> to vector<4x288xf32>
    %18 = tpu.concatenate %1, %3, %5, %7, %9, %11, %13, %15, %17 in 0 : vector<4x288xf32>, vector<4x288xf32>, vector<4x288xf32>, vector<4x288xf32>, vector<4x288xf32>, vector<4x288xf32>, vector<4x288xf32>, vector<4x288xf32>, vector<4x288xf32> -> vector<36x288xf32>
    %c0_18 = arith.constant 0 : index
    %c0_19 = arith.constant 0 : index
    %19 = vector.load %arg3[%c0_18, %c0_19] : memref<8x36xf32, #tpu.memory_space<vmem>>, vector<8x36xf32>
    %cst = arith.constant dense<0.000000e+00> : vector<8x288xf32>
    %20 = tpu.matmul %19, %18, %cst {dimension_numbers = #tpu.dot_dimension_numbers<[1], [0], [0], [1], [0, 0, 1, 1], [], []>} : vector<8x36xf32>, vector<36x288xf32>, vector<8x288xf32> -> vector<8x288xf32>
    %21 = vector.shape_cast %20 : vector<8x288xf32> to vector<8x16x18xf32>
    %22 = vector.extract_strided_slice %21 {offsets = [0, 0, 0], sizes = [8, 16, 16], strides = [1, 1, 1]} : vector<8x16x18xf32> to vector<8x16x16xf32>
    %23 = vector.shape_cast %22 : vector<8x16x16xf32> to vector<8x256xf32>
    %c0_20 = arith.constant 0 : index
    %c0_21 = arith.constant 0 : index
    %24 = vector.load %arg4[%c0_20, %c0_21] : memref<8x1xf32, #tpu.memory_space<vmem>>, vector<8x1xf32>
    %25 = vector.broadcast %24 : vector<8x1xf32> to vector<8x256xf32>
    %26 = arith.addf %23, %25 : vector<8x256xf32>
    %cst_22 = arith.constant 0.000000e+00 : f32
    %27 = vector.broadcast %cst_22 : f32 to vector<8x256xf32>
    %28 = arith.maximumf %26, %27 : vector<8x256xf32>
    %c0_23 = arith.constant 0 : index
    %c0_24 = arith.constant 0 : index
    %c0_25 = arith.constant 0 : index
    %29 = vector.load %arg5[%c0_23, %c0_24, %c0_25] : memref<1x8x256xf32, #tpu.memory_space<vmem>>, vector<1x8x256xf32>
    %30 = vector.shape_cast %29 : vector<1x8x256xf32> to vector<8x256xf32>
    %31 = vector.shape_cast %28 : vector<8x256xf32> to vector<1x8x256xf32>
    tpu.vector_store %arg5[%c0_23, %c0_24, %c0_25], %31 {strides = array<i32>} : memref<1x8x256xf32, #tpu.memory_space<vmem>>, vector<1x8x256xf32>,
    return
  }
  func.func @transform_0(%arg0: i32, %arg1: i32) -> (i32, i32, i32) {
    %c0_i32 = arith.constant 0 : i32
    %c0_i32_0 = arith.constant 0 : i32
    %c0_i32_1 = arith.constant 0 : i32
    return %arg0, %c0_i32, %c0_i32_0 : i32, i32, i32
  }
  func.func @transform_1(%arg0: i32, %arg1: i32) -> (i32, i32) {
    %c0_i32 = arith.constant 0 : i32
    %c0_i32_0 = arith.constant 0 : i32
    %c0_i32_1 = arith.constant 0 : i32
    return %c0_i32, %c0_i32_0 : i32, i32
  }
  func.func @transform_2(%arg0: i32, %arg1: i32) -> (i32, i32) {
    %c0_i32 = arith.constant 0 : i32
    %c0_i32_0 = arith.constant 0 : i32
    %c0_i32_1 = arith.constant 0 : i32
    return %c0_i32, %c0_i32_0 : i32, i32
  }
  func.func @transform_3(%arg0: i32, %arg1: i32) -> (i32, i32, i32) {
    %c0_i32 = arith.constant 0 : i32
    %c0_i32_0 = arith.constant 0 : i32
    return %arg0, %c0_i32, %arg1 : i32, i32, i32
  }
}

</mosaic_0001>

<bundles_post_ra>
// kernel: _conv_group.1
= control target key start
LH: loop header
LB: loop body
LE: loop exit
PB: predicated region body
PF: predicated region fallthrough
CT: control target
= control target key end

     0   :  { %s1469_s12 = smov 0   ;;  %s1471_s13 = smov 0   ;;  %s1675_s0 = inlined_call_operand.vmem [shape: f32[4,4,384], index: 0, kind: input, shape index: {}]   ;;  %s1676_s1 = inlined_call_operand.vmem [shape: f32[8,36], index: 1, kind: input, shape index: {}]   ;;  %s1677_s2 = inlined_call_operand.vmem [shape: f32[8,1], index: 2, kind: input, shape index: {}]   ;;  %s1678_s3 = inlined_call_operand.vmem [shape: f32[4,8,256], index: 3, kind: output, shape index: {}]  }
   0x1   :  { %s1473_s14 = smov 0  }
   0x2 LB: > { %s25_s15 = sadd.s32 1, %s1410_s13  ;;  %p1234_p0 = scmp.ge.s32.totalorder %s1414_s14, 1  ;;  %s1414_s14 = sphi %s1473_s14, %s13_s14   ;;  %s1410_s13 = sphi %s1471_s13, %s1680_s13   ;;  %s1406_s12 = sphi %s1469_s12, %s1679_s12  }
   0x3   : > { %p27_p1 = scmp.ge.s32.totalorder %s25_s15, 4  ;;  %p151_p2 = scmp.lt.s32.totalorder %s1414_s14, 5 }
   0x5   : > { %s1682_s15 = smov (%p27_p1, %s25_s15), 0  ;;  %p152_p3 = pnand %p1234_p0, %p151_p2 }
   0x6   : > { %p179_p4 = scmp.lt.s32.totalorder (!%p152_p3), %s1406_s12, 3  ;;  %v1416_v2 = vmov (!%p152_p3), 0.0|0.0   ;;  %s1417_s20 = smov (!%p152_p3), 126   ;;  %v1423_v8 = vmov (!%p152_p3), 0.0   ;;  %vm1424_vm0 = vmmov (!%p152_p3), 0   ;;  %vm208_vm1 = vcmask (!%p152_p3), 1039360  }
   0x7   : > { %155 = sbr.rel (%p152_p3) target bundleno = 685 (0x2ad), region = 32  ;;  %1289 = vmatprep.subr.bf16.mxu1 (!%p152_p3), %v1416_v2  ;;  %s1418_s21 = smov (!%p152_p3), 110   ;;  %383 = vmatprep.mubr.f32.mxu0 (!%p152_p3), %v1423_v8  ;;  %vm295_vm2 = vcmask (!%p152_p3), 1043456   ;;  %vm232_vm3 = vcmask (!%p152_p3), 900096   ;;  %vm220_vm4 = vcmask (!%p152_p3), 1031168   ;;  %vm244_vm5 = vcmask (!%p152_p3), 891904  }
   0x8   : > { %s1419_s22 = smov (!%p152_p3), 127   ;;  %s1420_s23 = smov (!%p152_p3), 109   ;;  %1278 = vmatprep.mubr.msk.f32.mxu1 (!%p152_p3), %vm1424_vm0, %v1423_v8  ;;  %vm256_vm6 = vcmask (!%p152_p3), 883712   ;;  %vm268_vm7 = vcmask (!%p152_p3), 752640   ;;  %vm280_vm8 = vcmask (!%p152_p3), 744448   ;;  %vm292_vm9 = vcmask (!%p152_p3), 736256  }
   0x9   : > { %s1421_s24 = smov (!%p152_p3), 108   ;;  %s1422_s25 = smov (!%p152_p3), 92   ;;  %vm309_vm10 = vcmask (!%p152_p3), 293888   ;;  %vm484_vm11 = vcmask (!%p152_p3), 15360   ;;  %vm510_vm12 = vcmask (!%p152_p3), 31744   ;;  %vm1116_vm13 = vcmask (!%p152_p3), 130048  }
   0xa   : > { %s1425_s26 = smov (!%p152_p3), 91   ;;  %s1426_s27 = smov (!%p152_p3), 90   ;;  %vm1118_vm14 = vcmask (!%p152_p3), 261120   ;;  %vm1120_vm15 = vcmask (!%p152_p3), 392192   ;;  %vm1122_vm0 = vcmask (!%p152_p3), 523264  }
   0xb   : > { %s1428_s30 = smov (!%p152_p3), 4   ;;  %s1429_s4 = smov (!%p152_p3), 2  }
   0xc   : > { %s1430_s5 = smov (!%p152_p3), 74   ;;  %s1431_s6 = smov (!%p152_p3), 56  }
   0xd   : > { %s1432_s7 = smov (!%p152_p3), 38   ;;  %s1433_s8 = smov (!%p152_p3), 20  }
   0xe   : > { %s1684_s12 = smov (!%p179_p4, %s1406_s12), 3  ;;  %s1434_s9 = smov 94  }
   0xf   : > { %s1295_s16 = smul.u32 12, %s1684_s12  ;;  %s1435_s10 = smov 58  }
  0x10   : > { %s1436_s11 = smov 112   ;;  %s1438_s17 = smov 40  }
  0x11   : > { %s183_s19 = scalar_lea.vmem %s1675_s0, %s1295_s16  ;;  %s1437_s16 = smov 76  }
  0x12   : > { %v1493_v0 = vld [vmem:[%s183_s19] sm:$0xff]  ;;  %v195_v1 = vld [vmem:[%s183_s19 + $0x8] sm:$0xf]  ;;  %s1439_s18 = smov 114   ;;  %s1440_s19 = smov 22  }
  0x13   : > { %214 = vrot.lane.b32.xlu0 %v1493_v0, %s1417_s20  ;;  %v201_v3 = vcombine.low %v195_v1, %v195_v1  ;;  %v198_v4 = vcombine.high %v1493_v0, %v1493_v0  ;;  %v200_v6 = vcombine.low %v1493_v0, %v1493_v0  ;;  %s1261_s28 = sshll.u32 %s1684_s12, 4 }
  0x15   : > { %v1363_v5 = vpack.i.bf16 %v201_v3, %v1493_v0  ;;  %v1358_v7 = vpack.i.bf16 %v195_v1, %v198_v4 }
  0x17   : > { %1364 = vrot.lane.b32.xlu1 %v1363_v5, %s1418_s21  ;;  %1354 = vrot.lane.b32.xlu0 %v1363_v5, %s1419_s22 }
  0x1b   : > { %202 = vrot.lane.b32.xlu1 %v200_v6, %s1419_s22  ;;  %1359 = vrot.lane.b32.xlu0 %v1358_v7, %s1417_s20  ;;  %s1443_s22 = smov 32  }
  0x1f   : > { %226 = vrot.lane.b32.xlu1 %v200_v6, %s1418_s21  ;;  %1369 = vrot.lane.b32.xlu0 %v1358_v7, %s1420_s23 }
  0x23   : > { %1374 = vrot.lane.b32.xlu1 %v1363_v5, %s1421_s24  ;;  %1379 = vrot.lane.b32.xlu0 %v1358_v7, %s1422_s25 }
  0x27   : > { %1384 = vrot.lane.b32.xlu1 %v1363_v5, %s1425_s26  ;;  %238 = vrot.lane.b32.xlu0 %v1493_v0, %s1420_s23  ;;  %s1444_s23 = smov 16  }
  0x2b   : > { %250 = vrot.lane.b32.xlu1 %v200_v6, %s1421_s24  ;;  %262 = vrot.lane.b32.xlu0 %v1493_v0, %s1422_s25  ;;  %s1445_s24 = smov 48  }
  0x2f   : > { %274 = vrot.lane.b32.xlu1 %v200_v6, %s1425_s26  ;;  %288 = vrot.lane.b32.xlu0 %v198_v4, %s1426_s27  ;;  %v308_v6 = vld [vmem:[%s1676_s1] sm:$0xff]  ;;  %s1447_s26 = smov 80  }
  0x33   : > { %290 = vrot.lane.b32.xlu1 %v195_v1, %s1426_s27  ;;  %286 = vrot.lane.b32.xlu0 %v1493_v0, %s1426_s27  ;;  %s1448_s27 = smov 96  }
  0x85   : > { %v215_v9 = vpop.permute.xlu0 %214 }
  0x89   : > { %v1365_v10 = vpop.permute.xlu1 %1364  ;;  %v1355_v11 = vpop.permute.xlu0 %1354 }
  0x8a   : > { %v1357_v12 = vunpack.i.h.bf16 %v1355_v11  ;;  %v1356_v13 = vunpack.i.l.bf16 %v1355_v11  ;;  %v1367_v14 = vunpack.i.h.bf16 %v1365_v10  ;;  %v1366_v15 = vunpack.i.l.bf16 %v1365_v10 }
  0x8b   : > { %v1427_v11 = vmov 0  }
  0x8c   : > { %v210_v16 = vsel %vm208_vm1, %v1356_v13, %v1357_v12  ;;  %v298_v21 = vsel %vm295_vm2, %v195_v1, %v1357_v12  ;;  %v234_v26 = vsel %vm232_vm3, %v1366_v15, %v1367_v14  ;;  %1388 = vset.pattern.permute.xlu0 %v1427_v11 }
  0x8d   : > { %v203_v17 = vpop.permute.xlu1 %202  ;;  %v1360_v18 = vpop.permute.xlu0 %1359  ;;  %v297_v22 = vsel %vm295_vm2, %v198_v4, %v210_v16  ;;  %v1137_v16 = vld [vmem:[%s1677_s2] sm:$0xff] }
  0x8e   : > { %v1362_v19 = vunpack.i.h.bf16 %v1360_v18  ;;  %v1361_v20 = vunpack.i.l.bf16 %v1360_v18  ;;  %v209_v23 = vsel %vm208_vm1, %v203_v17, %v1356_v13  ;;  %v1441_v17 = vmov 1983009808  }
  0x8f   : > { %v296_v34 = vsel %vm295_vm2, %v1493_v0, %v209_v23  ;;  %v519_v18 = vunpack.c.l.s4 %v1441_v17  ;;  %vm1124_vm1 = vcmask 654336  }
  0x90   : > { %v301_v24 = vsel %vm295_vm2, %v1362_v19, %v1367_v14  ;;  %v222_v25 = vsel %vm220_vm4, %v1361_v20, %v1362_v19  ;;  %v221_v33 = vsel %vm220_vm4, %v215_v9, %v1361_v20  ;;  %v521_v19 = vlaneseq }
  0x91   : > { %v227_v27 = vpop.permute.xlu1 %226  ;;  %v1370_v28 = vpop.permute.xlu0 %1369  ;;  %v1290_v29 = vpack.c.bf16 %v301_v24, %v298_v21  ;;  %v300_v30 = vsel %vm295_vm2, %v222_v25, %v234_v26  ;;  %v1442_v21 = vmov 1934713408   ;;  %v520_v23 = vunpack.c.0.s8 %v519_v18 }
  0x92   : > { %v233_v31 = vsel %vm232_vm3, %v227_v27, %v1366_v15  ;;  %v1281_v32 = vpack.c.bf16 %v300_v30, %v297_v22  ;;  %v1372_v37 = vunpack.i.h.bf16 %v1370_v28  ;;  %v1371_v38 = vunpack.i.l.bf16 %v1370_v28 }
  0x93   : > { %1291 = vmatpush3.bf16.msra.mxu1 %v1290_v29  ;;  %v299_v35 = vsel %vm295_vm2, %v221_v33, %v233_v31  ;;  %v583_v22 = vunpack.c.l.s4 %v1442_v21  ;;  %v522_v24 = vshrl.u32 %v521_v19, 7  ;;  %vm1128_vm3 = vcmask 916480  }
  0x94   : > { %1282 = vmatprep.subr.bf16.mxu0 %v1281_v32  ;;  %v1283_v36 = vpack.c.bf16 %v299_v35, %v296_v34  ;;  %1292 = vmatprep.subr.bf16.mxu1 %v1416_v2  ;;  %v246_v47 = vsel %vm244_vm5, %v1371_v38, %v1372_v37 }
  0x95   : > { %v1375_v39 = vpop.permute.xlu1 %1374  ;;  %v1380_v40 = vpop.permute.xlu0 %1379  ;;  %v584_v27 = vunpack.c.0.s8 %v583_v22  ;;  %v1548_v28 = vsub.s32 %v520_v23, %v522_v24 }
  0x96   : > { %v1377_v41 = vunpack.i.h.bf16 %v1375_v39  ;;  %v1376_v42 = vunpack.i.l.bf16 %v1375_v39  ;;  %v1382_v43 = vunpack.i.h.bf16 %v1380_v40  ;;  %v1381_v44 = vunpack.i.l.bf16 %v1380_v40  ;;  %1284 = vmatpush1.bf16.msra.mxu0 %v1283_v36 }
  0x97   : > { %v1550_v35 = vsub.s32 %v584_v27, %v522_v24 }
  0x98   : > { %v258_v50 = vsel %vm256_vm6, %v1376_v42, %v1377_v41  ;;  %v270_v51 = vsel %vm268_vm7, %v1381_v44, %v1382_v43  ;;  %v304_v53 = vsel %vm295_vm2, %v1372_v37, %v1377_v41 }
  0x99   : > { %v1385_v45 = vpop.permute.xlu1 %1384  ;;  %v239_v46 = vpop.permute.xlu0 %238  ;;  %v303_v58 = vsel %vm295_vm2, %v246_v47, %v258_v50 }
  0x9a   : > { %v1387_v48 = vunpack.i.h.bf16 %v1385_v45  ;;  %v1386_v49 = vunpack.i.l.bf16 %v1385_v45  ;;  %v245_v0 = vsel %vm244_vm5, %v239_v46, %v1371_v38 }
  0x9c   : > { %v282_v52 = vsel %vm280_vm8, %v1386_v49, %v1387_v48  ;;  %v307_v54 = vsel %vm295_vm2, %v1382_v43, %v1387_v48 }
  0x9d   : > { %v251_v55 = vpop.permute.xlu1 %250  ;;  %v263_v56 = vpop.permute.xlu0 %262  ;;  %v1293_v57 = vpack.c.bf16 %v307_v54, %v304_v53  ;;  %v306_v59 = vsel %vm295_vm2, %v270_v51, %v282_v52 }
  0x9e   : > { %v1285_v60 = vpack.c.bf16 %v306_v59, %v303_v58  ;;  %v257_v61 = vsel %vm256_vm6, %v251_v55, %v1376_v42  ;;  %v269_v1 = vsel %vm268_vm7, %v263_v56, %v1381_v44 }
  0x9f   : > { %1294 = vmatpush3.bf16.msra.mxu1 %v1293_v57  ;;  %v302_v3 = vsel %vm295_vm2, %v245_v0, %v257_v61 }
  0xa0   : > { %1286 = vmatprep.subr.bf16.mxu0 %v1285_v60  ;;  %1276 = vmatprep.subr.mxu1 %v1423_v8 }
  0xa1   : > { %v275_v62 = vpop.permute.xlu1 %274  ;;  %v289_v63 = vpop.permute.xlu0 %288 }
  0xa2   : > { %v281_v2 = vsel %vm280_vm8, %v275_v62, %v1386_v49 }
  0xa3   : > { %v305_v4 = vsel %vm295_vm2, %v269_v1, %v281_v2 }
  0xa4   : > { %v1287_v5 = vpack.c.bf16 %v305_v4, %v302_v3 }
  0xa5   : > { %v291_v7 = vpop.permute.xlu1 %290  ;;  %v287_v9 = vpop.permute.xlu0 %286 }
  0xa6   : > { %v294_v8 = vsel %vm292_vm9, %v289_v63, %v291_v7  ;;  %1288 = vmatpush1.bf16.msra.mxu0 %v1287_v5  ;;  %1277 = vmatpush3.msk.msra.mxu1 %vm295_vm2, %v291_v7  ;;  %v293_v10 = vsel %vm292_vm9, %v287_v9, %v289_v63 }
  0xa7   : > { %1238 = vmatprep.subr.msk.mxu0 %vm295_vm2, %v294_v8  ;;  %1279 = vmatmul.mubr.msk.f32.vlgmr.msra.gmra.mrb[0].mxu1 %vm309_vm10, %v308_v6 }
  0xaa   : > { %1239 = vmatpush1.msk.msra.mxu0 %vm295_vm2, %v293_v10  ;;  %vm1126_vm2 = vcmask 785408  }
  0xab   : > { %1240 = vmatmul.mubr.msk.f32.vlgmr.msra.gmra.mrb[0].mxu0 %vm309_vm10, %v308_v6 }
 0x17a   : > { %v456_v12 = vpop.f32.mrb[0].mxu1 }
 0x17b   : > { %508 = vrot.lane.b32.xlu1 %v456_v12, %s1428_s30  ;;  %v1280_v13 = vpop.f32.mrb[1].mxu1 }
 0x17e   : > { %v385_v14 = vpop.f32.mrb[0].mxu0 }
 0x17f   : > { %464 = vrot.lane.b32.xlu0 %v385_v14, %s1422_s25  ;;  %461 = vrot.lane.b32.xlu1 %v385_v14, %s1418_s21  ;;  %v387_v15 = vpop.f32.mrb[1].mxu0  ;;  %s1446_s25 = smov 64  }
 0x183   : > { %480 = vrot.lane.b32.xlu0 %v385_v14, %s1429_s4  ;;  %467 = vrot.lane.b32.xlu1 %v385_v14, %s1430_s5 }
 0x187   : > { %470 = vrot.lane.b32.xlu0 %v385_v14, %s1431_s6  ;;  %473 = vrot.lane.b32.xlu1 %v385_v14, %s1432_s7 }
 0x18b   : > { %476 = vrot.lane.b32.xlu0 %v385_v14, %s1433_s8  ;;  %490 = vrot.lane.b32.xlu1 %v387_v15, %s1434_s9 }
 0x18f   : > { %496 = vrot.lane.b32.xlu1 %v387_v15, %s1435_s10  ;;  %487 = vrot.lane.b32.xlu0 %v387_v15, %s1436_s11 }
 0x193   : > { %482 = vrot.lane.b32.xlu1 %v387_v15, %s1429_s4  ;;  %493 = vrot.lane.b32.xlu0 %v387_v15, %s1437_s16  ;;  %s192_s4 = scalar_lea.vmem %s1678_s3, %s1261_s28 }
 0x197   : > { %499 = vrot.lane.b32.xlu1 %v387_v15, %s1438_s17  ;;  %506 = vrot.lane.b32.xlu0 %v387_v15, %s1428_s30 }
 0x19b   : > { %513 = vrot.lane.b32.xlu1 %v456_v12, %s1439_s18  ;;  %502 = vrot.lane.b32.xlu0 %v387_v15, %s1440_s19 }
 0x19f   : > { %1140 = vperm.xlu0 %1388, %v1137_v16  }
 0x1ed   : > { %v1546_v20 = vpop.permute.xlu1 %508 }
 0x1f1   : > { %v465_v25 = vpop.permute.xlu0 %464  ;;  %v462_v26 = vpop.permute.xlu1 %461 }
 0x1f2   : > { %v516_v29 = vcombine.low %v385_v14, %v465_v25  ;;  %v517_v30 = vcombine.high %v385_v14, %v465_v25 }
 0x1f4   : > { %v524_v36 = vrot.slane %v516_v29, %v1548_v28  ;;  %v531_v37 = vrot.slane %v517_v30, %v1548_v28 }
 0x1f5   : > { %v481_v31 = vpop.permute.xlu0 %480  ;;  %v468_v32 = vpop.permute.xlu1 %467 }
 0x1f6   : > { %v532_v33 = vcombine.low %v462_v26, %v468_v32  ;;  %v533_v34 = vcombine.high %v462_v26, %v468_v32 }
 0x1f8   : > { %v540_v38 = vrot.slane %v532_v33, %v1548_v28  ;;  %v547_v39 = vrot.slane %v533_v34, %v1548_v28 }
 0x1f9   : > { %v471_v40 = vpop.permute.xlu0 %470  ;;  %v474_v41 = vpop.permute.xlu1 %473 }
 0x1fa   : > { %v580_v42 = vcombine.low %v524_v36, %v540_v38  ;;  %v581_v43 = vcombine.high %v524_v36, %v540_v38  ;;  %v596_v44 = vcombine.low %v531_v37, %v547_v39  ;;  %v597_v45 = vcombine.high %v531_v37, %v547_v39 }
 0x1fc   : > { %v588_v46 = vrot.slane %v580_v42, %v1550_v35  ;;  %v595_v47 = vrot.slane %v581_v43, %v1550_v35  ;;  %v604_v48 = vrot.slane %v596_v44, %v1550_v35  ;;  %v611_v49 = vrot.slane %v597_v45, %v1550_v35 }
 0x1fd   : > { %v477_v50 = vpop.permute.xlu0 %476  ;;  %v491_v51 = vpop.permute.xlu1 %490 }
 0x1fe   : > { %v1243_v52 = vcombine.low %v588_v46, %v595_v47  ;;  %v1245_v53 = vcombine.high %v588_v46, %v595_v47  ;;  %v1247_v54 = vcombine.low %v604_v48, %v611_v49  ;;  %v1249_v55 = vcombine.high %v604_v48, %v611_v49 }
 0x1ff   : > { %v548_v60 = vcombine.low %v471_v40, %v477_v50  ;;  %v549_v7 = vcombine.high %v471_v40, %v477_v50 }
 0x200   : > { %v796_v56 = vrot.slane %v1243_v52, %v1548_v28  ;;  %v812_v57 = vrot.slane %v1245_v53, %v1548_v28  ;;  %v828_v58 = vrot.slane %v1247_v54, %v1548_v28  ;;  %v844_v59 = vrot.slane %v1249_v55, %v1548_v28 }
 0x201   : > { %v497_v61 = vpop.permute.xlu1 %496  ;;  %v488_v62 = vpop.permute.xlu0 %487  ;;  %v556_v8 = vrot.slane %v548_v60, %v1548_v28  ;;  %v563_v26 = vrot.slane %v549_v7, %v1548_v28 }
 0x202   : > { %v853_v63 = vcombine.high %v796_v56, %v812_v57  ;;  %v885_v0 = vcombine.high %v828_v58, %v844_v59  ;;  %v668_v1 = vcombine.low %v491_v51, %v497_v61  ;;  %v852_v2 = vcombine.low %v796_v56, %v812_v57 }
 0x203   : > { %v884_v3 = vcombine.low %v828_v58, %v844_v59  ;;  %v669_v4 = vcombine.high %v491_v51, %v497_v61 }
 0x204   : > { %v867_v5 = vrot.slane %v853_v63, %v1550_v35  ;;  %v899_v6 = vrot.slane %v885_v0, %v1550_v35  ;;  %v1568_v11 = vrot.slane %v852_v2, %v1550_v35  ;;  %v676_v17 = vrot.slane %v668_v1, %v1548_v28 }
 0x205   : > { %v483_v9 = vpop.permute.xlu1 %482  ;;  %v494_v10 = vpop.permute.xlu0 %493  ;;  %v1571_v12 = vrot.slane %v884_v3, %v1550_v35  ;;  %v683_v22 = vrot.slane %v669_v4, %v1548_v28 }
 0x206   : > { %v485_v13 = vsel %vm484_vm11, %v481_v31, %v483_v9  ;;  %v652_v14 = vcombine.low %v488_v62, %v494_v10  ;;  %v653_v15 = vcombine.high %v488_v62, %v494_v10  ;;  %v918_v16 = vcombine.low %v867_v5, %v899_v6 }
 0x207   : > { %v564_v18 = vcombine.low %v474_v41, %v485_v13  ;;  %v565_v19 = vcombine.high %v474_v41, %v485_v13  ;;  %v917_v21 = vcombine.high %v1568_v11, %v1571_v12  ;;  %v916_v25 = vcombine.low %v1568_v11, %v1571_v12 }
 0x208   : > { %v660_v23 = vrot.slane %v652_v14, %v1548_v28  ;;  %v667_v24 = vrot.slane %v653_v15, %v1548_v28  ;;  %1065 = vrot.lane.b32.xlu1 %v918_v16, %s1443_s22  ;;  %v919_v32 = vcombine.high %v867_v5, %v899_v6 }
 0x209   : > { %v572_v27 = vrot.slane %v564_v18, %v1548_v28  ;;  %v579_v29 = vrot.slane %v565_v19, %v1548_v28  ;;  %1061 = vrot.lane.b32.xlu0 %v917_v21, %s1444_s23  ;;  %v500_v30 = vpop.permute.xlu1 %499  ;;  %v507_v31 = vpop.permute.xlu0 %506 }
 0x20a   : > { %v716_v33 = vcombine.low %v660_v23, %v676_v17  ;;  %v717_v34 = vcombine.high %v660_v23, %v676_v17  ;;  %v732_v36 = vcombine.low %v667_v24, %v683_v22  ;;  %v733_v37 = vcombine.high %v667_v24, %v683_v22 }
 0x20b   : > { %v612_v38 = vcombine.low %v556_v8, %v572_v27  ;;  %v613_v39 = vcombine.high %v556_v8, %v572_v27  ;;  %v628_v40 = vcombine.low %v563_v26, %v579_v29  ;;  %v629_v41 = vcombine.high %v563_v26, %v579_v29 }
 0x20c   : > { %v724_v42 = vrot.slane %v716_v33, %v1550_v35  ;;  %v731_v43 = vrot.slane %v717_v34, %v1550_v35  ;;  %v740_v44 = vrot.slane %v732_v36, %v1550_v35  ;;  %v747_v45 = vrot.slane %v733_v37, %v1550_v35 }
 0x20d   : > { %v620_v46 = vrot.slane %v612_v38, %v1550_v35  ;;  %v627_v47 = vrot.slane %v613_v39, %v1550_v35  ;;  %v636_v48 = vrot.slane %v628_v40, %v1550_v35  ;;  %v643_v49 = vrot.slane %v629_v41, %v1550_v35  ;;  %1069 = vrot.lane.b32.xlu0 %v919_v32, %s1445_s24  ;;  %v514_v50 = vpop.permute.xlu1 %513  ;;  %v503_v51 = vpop.permute.xlu0 %502 }
 0x20e   : > { %v1251_v52 = vcombine.low %v724_v42, %v731_v43  ;;  %v1253_v53 = vcombine.high %v724_v42, %v731_v43  ;;  %v1255_v54 = vcombine.low %v740_v44, %v747_v45  ;;  %v1257_v55 = vcombine.high %v740_v44, %v747_v45 }
 0x20f   : > { %v1244_v56 = vcombine.low %v620_v46, %v627_v47  ;;  %v1246_v57 = vcombine.high %v620_v46, %v627_v47  ;;  %v1248_v58 = vcombine.low %v636_v48, %v643_v49  ;;  %v1250_v59 = vcombine.high %v636_v48, %v643_v49 }
 0x210   : > { %v511_v60 = vsel %vm510_vm12, %v507_v31, %v1546_v20  ;;  %v700_v61 = vcombine.low %v503_v51, %v514_v50  ;;  %v701_v62 = vcombine.high %v503_v51, %v514_v50  ;;  %v932_v63 = vrot.slane %v1251_v52, %v1548_v28 }
 0x211   : > { %v684_v0 = vcombine.low %v500_v30, %v511_v60  ;;  %v685_v1 = vcombine.high %v500_v30, %v511_v60  ;;  %v948_v2 = vrot.slane %v1253_v53, %v1548_v28  ;;  %v964_v3 = vrot.slane %v1255_v54, %v1548_v28 }
 0x212   : > { %v708_v4 = vrot.slane %v700_v61, %v1548_v28  ;;  %v715_v5 = vrot.slane %v701_v62, %v1548_v28  ;;  %v980_v6 = vrot.slane %v1257_v55, %v1548_v28  ;;  %v803_v7 = vrot.slane %v1244_v56, %v1548_v28 }
 0x213   : > { %v692_v20 = vrot.slane %v684_v0, %v1548_v28  ;;  %v699_v8 = vrot.slane %v685_v1, %v1548_v28  ;;  %v988_v9 = vcombine.low %v932_v63, %v948_v2  ;;  %v819_v10 = vrot.slane %v1246_v57, %v1548_v28 }
 0x214   : > { %v1020_v13 = vcombine.low %v964_v3, %v980_v6  ;;  %v835_v14 = vrot.slane %v1248_v58, %v1548_v28  ;;  %v851_v15 = vrot.slane %v1250_v59, %v1548_v28  ;;  %v989_v16 = vcombine.high %v932_v63, %v948_v2 }
 0x215   : > { %v748_v17 = vcombine.low %v692_v20, %v708_v4  ;;  %v749_v18 = vcombine.high %v692_v20, %v708_v4  ;;  %v764_v19 = vcombine.low %v699_v8, %v715_v5  ;;  %v765_v21 = vcombine.high %v699_v8, %v715_v5 }
 0x216   : > { %v1610_v22 = vrot.slane %v988_v9, %v1550_v35  ;;  %v1613_v23 = vrot.slane %v1020_v13, %v1550_v35  ;;  %v868_v24 = vcombine.low %v803_v7, %v819_v10  ;;  %v900_v26 = vcombine.low %v835_v14, %v851_v15 }
 0x217   : > { %v756_v27 = vrot.slane %v748_v17, %v1550_v35  ;;  %v763_v29 = vrot.slane %v749_v18, %v1550_v35  ;;  %v772_v30 = vrot.slane %v764_v19, %v1550_v35  ;;  %v779_v31 = vrot.slane %v765_v21, %v1550_v35 }
 0x218   : > { %v1053_v32 = vcombine.high %v1610_v22, %v1613_v23  ;;  %v876_v33 = vrot.slane %v868_v24, %v1550_v35  ;;  %v908_v34 = vrot.slane %v900_v26, %v1550_v35  ;;  %v1003_v41 = vrot.slane %v989_v16, %v1550_v35 }
 0x219   : > { %v1252_v36 = vcombine.low %v756_v27, %v763_v29  ;;  %v1254_v37 = vcombine.high %v756_v27, %v763_v29  ;;  %v1256_v38 = vcombine.low %v772_v30, %v779_v31  ;;  %v1258_v39 = vcombine.high %v772_v30, %v779_v31 }
 0x21a   : > { %1089 = vrot.lane.b32.xlu1 %v1053_v32, %s1444_s23  ;;  %v920_v40 = vcombine.low %v876_v33, %v908_v34  ;;  %v1021_v42 = vcombine.high %v964_v3, %v980_v6  ;;  %v869_v43 = vcombine.high %v803_v7, %v819_v10  ;;  %v901_v44 = vcombine.high %v835_v14, %v851_v15 }
 0x21b   : > { %v939_v45 = vrot.slane %v1252_v36, %v1548_v28  ;;  %v955_v46 = vrot.slane %v1254_v37, %v1548_v28  ;;  %v971_v47 = vrot.slane %v1256_v38, %v1548_v28  ;;  %v987_v49 = vrot.slane %v1258_v39, %v1548_v28 }
 0x21c   : > { %1073 = vrot.lane.b32.xlu0 %v920_v40, %s1446_s25  ;;  %v1035_v48 = vrot.slane %v1021_v42, %v1550_v35  ;;  %v1052_v50 = vcombine.low %v1610_v22, %v1613_v23  ;;  %v921_v51 = vcombine.high %v876_v33, %v908_v34  ;;  %v883_v52 = vrot.slane %v869_v43, %v1550_v35 }
 0x21d   : > { %v915_v54 = vrot.slane %v901_v44, %v1550_v35  ;;  %v1004_v55 = vcombine.low %v939_v45, %v955_v46  ;;  %v1036_v56 = vcombine.low %v971_v47, %v987_v49  ;;  %v1005_v62 = vcombine.high %v939_v45, %v955_v46 }
 0x21e   : > { %v1054_v53 = vcombine.low %v1003_v41, %v1035_v48  ;;  %v1055_v57 = vcombine.high %v1003_v41, %v1035_v48  ;;  %v1037_v63 = vcombine.high %v971_v47, %v987_v49  ;;  %v1141_v5 = vpop.permute.xlu0 %1140 }
 0x21f   : > { %v922_v58 = vcombine.low %v883_v52, %v915_v54  ;;  %v1012_v59 = vrot.slane %v1004_v55, %v1550_v35  ;;  %v1044_v28 = vrot.slane %v1036_v56, %v1550_v35  ;;  %v923_v61 = vcombine.high %v883_v52, %v915_v54 }
 0x220   : > { %1093 = vrot.lane.b32.xlu1 %v1054_v53, %s1443_s22  ;;  %1077 = vrot.lane.b32.xlu0 %v921_v51, %s1447_s26  ;;  %v1019_v1 = vrot.slane %v1005_v62, %v1550_v35  ;;  %v1051_v2 = vrot.slane %v1037_v63, %v1550_v35 }
 0x221   : > { %v1056_v60 = vcombine.low %v1012_v59, %v1044_v28  ;;  %v1057_v0 = vcombine.high %v1012_v59, %v1044_v28 }
 0x222   : > { %v1058_v3 = vcombine.low %v1019_v1, %v1051_v2  ;;  %v1059_v4 = vcombine.high %v1019_v1, %v1051_v2 }
 0x224   : > { %1097 = vrot.lane.b32.xlu1 %v1055_v57, %s1445_s24  ;;  %1081 = vrot.lane.b32.xlu0 %v922_v58, %s1448_s27 }
 0x228   : > { %1101 = vrot.lane.b32.xlu1 %v1056_v60, %s1446_s25  ;;  %1085 = vrot.lane.b32.xlu0 %v923_v61, %s1436_s11 }
 0x22c   : > { %1105 = vrot.lane.b32.xlu1 %v1057_v0, %s1447_s26 }
 0x230   : > { %1109 = vrot.lane.b32.xlu1 %v1058_v3, %s1448_s27 }
 0x234   : > { %1113 = vrot.lane.b32.xlu1 %v1059_v4, %s1436_s11 }
 0x27a   : > { %v1066_v7 = vpop.permute.xlu1 %1065 }
 0x27b   : > { %v1062_v6 = vpop.permute.xlu0 %1061 }
 0x27c   : > { %v1117_v35 = vsel %vm1116_vm13, %v916_v25, %v1062_v6 }
 0x27d   : > { %v1119_v14 = vsel %vm1118_vm14, %v1117_v35, %v1066_v7 }
 0x27f   : > { %v1070_v20 = vpop.permute.xlu0 %1069 }
 0x280   : > { %v1121_v17 = vsel %vm1120_vm15, %v1119_v14, %v1070_v20 }
 0x28c   : > { %v1090_v8 = vpop.permute.xlu1 %1089 }
 0x28d   : > { %v1130_v29 = vsel %vm1116_vm13, %v1052_v50, %v1090_v8 }
 0x28e   : > { %v1074_v9 = vpop.permute.xlu0 %1073 }
 0x28f   : > { %v1123_v18 = vsel %vm1122_vm0, %v1121_v17, %v1074_v9 }
 0x292   : > { %v1094_v10 = vpop.permute.xlu1 %1093  ;;  %v1078_v13 = vpop.permute.xlu0 %1077 }
 0x293   : > { %v1125_v19 = vsel %vm1124_vm1, %v1123_v18, %v1078_v13  ;;  %v1131_v30 = vsel %vm1118_vm14, %v1130_v29, %v1094_v10 }
 0x296   : > { %v1098_v15 = vpop.permute.xlu1 %1097  ;;  %v1082_v16 = vpop.permute.xlu0 %1081 }
 0x297   : > { %v1127_v11 = vsel %vm1126_vm2, %v1125_v19, %v1082_v16  ;;  %v1132_v32 = vsel %vm1120_vm15, %v1131_v30, %v1098_v15 }
 0x29a   : > { %v1102_v12 = vpop.permute.xlu1 %1101  ;;  %v1086_v25 = vpop.permute.xlu0 %1085 }
 0x29b   : > { %v1129_v21 = vsel %vm1128_vm3, %v1127_v11, %v1086_v25  ;;  %v1133_v33 = vsel %vm1122_vm0, %v1132_v32, %v1102_v12 }
 0x29c   : > { %v1143_v24 = vadd.f32 %v1141_v5, %v1129_v21 }
 0x29e   : > { %v1145_v26 = vmax.f32 %v1143_v24, 0.0  ;;  %v1106_v27 = vpop.permute.xlu1 %1105 }
 0x29f   : > { %v1134_v34 = vsel %vm1124_vm1, %v1133_v33, %v1106_v27 }
 0x2a0   : > { %1147 = vst [vmem:[%s192_s4] sm:$0xff] %v1145_v26 }
 0x2a2   : > { %v1110_v31 = vpop.permute.xlu1 %1109 }
 0x2a3   : > { %v1135_v36 = vsel %vm1126_vm2, %v1134_v34, %v1110_v31 }
 0x2a6   : > { %v1114_v37 = vpop.permute.xlu1 %1113 }
 0x2a7   : > { %v1136_v38 = vsel %vm1128_vm3, %v1135_v36, %v1114_v37 }
 0x2a8   : > { %v1144_v39 = vadd.f32 %v1141_v5, %v1136_v38 }
 0x2aa   : > { %v1146_v40 = vmax.f32 %v1144_v39, 0.0 }
 0x2ac   : > { %1148 = vst [vmem:[%s192_s4 + $0x8] sm:$0xff] %v1146_v40 }
 0x2ad PF: > { %s13_s14 = sadd.s32 1, %s1414_s14   ;;  %s1679_s12 = smov %s1410_s13 }
 0x2ae   : > { %p10_p5 = scmp.ge.s32.totalorder %s13_s14, 6   ;;  %s1680_s13 = smov %s1682_s15 }
 0x2b0   :  { %12 = sbr.rel (!%p10_p5) target bundleno = 2 (0x2), region = 62 }

</bundles_post_ra>
